<compile_context>
chip_gen: v7x
topology: tpu7x:2x2x1
jax: 0.10.0
libtpu: 0.0.40
codegen_flags: <defaults>
</compile_context>

<pallas_src>
import functools

import jax
import jax.numpy as jnp
from jax.experimental import pallas as pl
from jax.experimental.pallas import tpu as pltpu


def positive_norm(w, axis=-1, eps=1e-12):
    """F.normalize(F.relu(w), p=1, dim=axis)  (the NormLinear parametrization)."""
    w = jnp.maximum(w, 0.0)
    denom = jnp.maximum(jnp.sum(jnp.abs(w), axis=axis, keepdims=True), eps)
    return w / denom


def _pick_q_tile(n, max_tq=256):
    """Largest q tile <= max_tq that divides N and is a multiple of 8 (or N itself)."""
    if n <= max_tq:
        return n
    for t in range(max_tq, 7, -8):
        if n % t == 0:
            return t
    return n  # no clean tile found -> whole sequence (correct, just un-tiled)


def _attention_kernel(x_ref, wqkv_ref, wp_ref, pb_ref, o_ref,
                      q_scr, k_scr, v_scr, *,
                      num_heads: int, head_dim: int, seq_len: int, dim: int,
                      q_tile: int):
    """Grid = (B, N // q_tile).  One step = one q tile of one batch element.

    x_ref    : (N, C)        VMEM, compute dtype (batch dim squeezed; constant per b)
    wqkv_ref : (C, 3C)       VMEM, normalized+transposed [Wq*scale | Wk | Wv]
    wp_ref   : (C, C)        VMEM, transposed proj weight
    pb_ref   : (1, C)        VMEM, proj bias (f32)
    o_ref    : (TQ, C)       VMEM output tile
    q_scr/k_scr/v_scr : (H, N, Dh) VMEM scratch, persists across the q-tile axis
    """
    H, Dh, N, C, TQ = num_heads, head_dim, seq_len, dim, q_tile
    qi = pl.program_id(1)

    # ---- once per batch element (first q tile): project Q/K/V for the whole sequence.
    # bf16 MXU matmuls with f32 accumulation; softmax scale pre-folded into Wq.
    # Slices of the f32 accumulator are cast per-slice into head-major scratch
    # (no full (N, 3C) cast temporary).
    @pl.when(qi == 0)
    def _():
        x_full = x_ref[...]                                            # (N, C)
        for idx, scr in enumerate((q_scr, k_scr, v_scr)):
            t = jnp.dot(x_full, wqkv_ref[:, idx * C:(idx + 1) * C],
                        preferred_element_type=jnp.float32)            # (N, C) f32
            t = jnp.transpose(t.reshape(N, H, Dh), (1, 0, 2))          # (H, N, Dh)
            scr[...] = t.astype(scr.dtype)

    # ---- per q tile: attention of TQ query rows against the full resident K/V.
    q0 = pl.multiple_of(qi * TQ, TQ)
    q = q_scr[:, pl.ds(q0, TQ), :]                                     # (H, TQ, Dh)
    k = k_scr[...]                                                     # (H, N, Dh)
    v = v_scr[...]                                                     # (H, N, Dh)

    s = jnp.einsum('hqd,hkd->hqk', q, k,
                   preferred_element_type=jnp.float32)                 # (H, TQ, N) f32
    s = s - jnp.max(s, axis=-1, keepdims=True)
    p = jnp.exp(s)
    p = p * pl.reciprocal(jnp.sum(p, axis=-1, keepdims=True), approx=True)

    # Context directly in (q, h, d) order; reshape (no extra transpose) merges heads.
    ctx = jnp.einsum('hqk,hkd->qhd', p.astype(v.dtype), v,
                     preferred_element_type=jnp.float32)               # (TQ, H, Dh)
    ctx2 = ctx.reshape(TQ, C).astype(x_ref.dtype)                      # (TQ, C) compute dtype

    out = jnp.dot(ctx2, wp_ref[...], preferred_element_type=jnp.float32)
    out = out + pb_ref[...]                                            # f32 bias
    o_ref[...] = out.astype(o_ref.dtype)


def attention_forward(x, wq, wk, wv, wp, pb, *, num_heads: int,
                      q_tile: int | None = None,
                      compute_dtype=jnp.bfloat16):
    """x: (B, N, C); wq/wk/wv/wp: (C, C) raw nn.Linear weights (out, in); pb: (C,)."""
    B, N, C = x.shape
    assert C % num_heads == 0
    head_dim = C // num_heads
    scale = head_dim ** -0.5

    tq = q_tile if q_tile is not None else _pick_q_tile(N)
    assert N % tq == 0 and (tq == N or tq % 8 == 0), "q_tile must divide N (multiple of 8)"
    n_q = N // tq

    # Parameter glue (plain JAX, one-time): positive-norm parametrization, transpose to
    # (in, out), fold the softmax scale into Wq, fuse QKV columns, cast to compute dtype.
    wq_t = positive_norm(wq, axis=-1).T * scale
    wk_t = positive_norm(wk, axis=-1).T
    wv_t = positive_norm(wv, axis=-1).T
    w_qkv = jnp.concatenate([wq_t, wk_t, wv_t], axis=1).astype(compute_dtype)  # (C, 3C)
    wp_t = wp.T.astype(compute_dtype)                                          # (C, C)
    pb2 = pb.reshape(1, C).astype(jnp.float32)
    x_c = x.astype(compute_dtype)

    kernel = functools.partial(_attention_kernel, num_heads=num_heads,
                               head_dim=head_dim, seq_len=N, dim=C, q_tile=tq)

    return pl.pallas_call(
        kernel,
        out_shape=jax.ShapeDtypeStruct((B, N, C), x.dtype),
        grid_spec=pltpu.PrefetchScalarGridSpec(
            num_scalar_prefetch=0,
            grid=(B, n_q),
            in_specs=[
                # x: constant block index within a batch element -> DMA'd once per b.
                pl.BlockSpec((None, N, C), lambda b, q: (b, 0, 0)),
                # Constant-index weights / bias -> fetched once, reused every step.
                pl.BlockSpec((C, 3 * C), lambda b, q: (0, 0)),
                pl.BlockSpec((C, C), lambda b, q: (0, 0)),
                pl.BlockSpec((1, C), lambda b, q: (0, 0)),
            ],
            out_specs=pl.BlockSpec((None, tq, C), lambda b, q: (b, q, 0)),
            scratch_shapes=[
                pltpu.VMEM((num_heads, N, head_dim), compute_dtype),  # Q (head-major)
                pltpu.VMEM((num_heads, N, head_dim), compute_dtype),  # K
                pltpu.VMEM((num_heads, N, head_dim), compute_dtype),  # V
            ],
        ),
        compiler_params=pltpu.CompilerParams(
            # batch axis parallel (megacore), q-tile axis arbitrary (scratch carry).
            dimension_semantics=("parallel", "arbitrary"),
            vmem_limit_bytes=48 * 1024 * 1024,
        ),
    )(x_c, w_qkv, wp_t, pb2)


def attention_reference(x, wq, wk, wv, wp, pb, *, num_heads: int):
    """Pure-JAX f32 reference mirroring the PyTorch forward (eval mode)."""
    B, N, C = x.shape
    head_dim = C // num_heads
    scale = head_dim ** -0.5

    def proj(x, w):
        return jnp.einsum('bnc,oc->bno', x, positive_norm(w, axis=-1))

    def to_heads(t):
        return t.reshape(B, N, num_heads, head_dim).transpose(0, 2, 1, 3)

    q = to_heads(proj(x, wq)) * scale
    k = to_heads(proj(x, wk))
    v = to_heads(proj(x, wv))

    attn = jnp.einsum('bhqd,bhkd->bhqk', q, k)
    attn = jax.nn.softmax(attn, axis=-1)
    ctx = jnp.einsum('bhqk,bhkd->bhqd', attn, v)
    ctx = ctx.transpose(0, 2, 1, 3).reshape(B, N, C)
    return jnp.einsum('bnc,oc->bno', ctx, wp) + pb


if __name__ == "__main__":
    # Small but TPU-friendly shapes: C multiple of 128, head_dim = 64 (nViT default).
    B, N, C = 2, 16, 128
    num_heads = 2

    key = jax.random.PRNGKey(0)
    kx, kq, kk, kv, kp, kb = jax.random.split(key, 6)

    x = jax.random.normal(kx, (B, N, C), dtype=jnp.float32)
    # nn.Linear-style weight shapes: (out_features, in_features)
    wq = jax.random.normal(kq, (C, C), dtype=jnp.float32) * 0.1
    wk = jax.random.normal(kk, (C, C), dtype=jnp.float32) * 0.1
    wv = jax.random.normal(kv, (C, C), dtype=jnp.float32) * 0.1
    wp = jax.random.normal(kp, (C, C), dtype=jnp.float32) * 0.1
    pb = jax.random.normal(kb, (C,), dtype=jnp.float32) * 0.1

    ref = attention_reference(x, wq, wk, wv, wp, pb, num_heads=num_heads)

    # f32 compute path, q_tile=8 -> exercises the multi-q-tile scratch carry (tight check
    # of the kernel structure; approx reciprocal -> slightly loosened tolerance).
    out_f32 = attention_forward(x, wq, wk, wv, wp, pb, num_heads=num_heads,
                                q_tile=8, compute_dtype=jnp.float32)
    out_f32 = jax.block_until_ready(out_f32)
    assert out_f32.shape == (B, N, C)
    assert jnp.allclose(out_f32, ref, atol=5e-3, rtol=5e-3), "f32 kernel mismatch vs. reference"

    # bf16 compute path (production configuration; bf16 rounding -> looser tolerance).
    out_bf16 = attention_forward(x, wq, wk, wv, wp, pb, num_heads=num_heads, q_tile=8)
    out_bf16 = jax.block_until_ready(out_bf16)
    assert out_bf16.shape == (B, N, C)
    assert jnp.allclose(out_bf16, ref, atol=3e-2, rtol=3e-2), "bf16 kernel mismatch vs. reference"

    print("KERNEL_OK")
</pallas_src>

<mosaic_0001>
module attributes {stable_mosaic.version = 11 : i64} {
  func.func @_attention_kernel(%arg0: i32, %arg1: i32, %arg2: memref<1x16x128xf32, #tpu.memory_space<vmem>>, %arg3: memref<128x384xf32, #tpu.memory_space<vmem>>, %arg4: memref<128x128xf32, #tpu.memory_space<vmem>>, %arg5: memref<1x128xf32, #tpu.memory_space<vmem>>, %arg6: memref<1x8x128xf32, #tpu.memory_space<vmem>>, %arg7: memref<2x16x64xf32, #tpu.memory_space<vmem>>, %arg8: memref<2x16x64xf32, #tpu.memory_space<vmem>>, %arg9: memref<2x16x64xf32, #tpu.memory_space<vmem>>) attributes {dimension_semantics = [#tpu.dimension_semantics<parallel>, #tpu.dimension_semantics<arbitrary>], iteration_bounds = array<i64: 2, 2>, scalar_prefetch = 0 : i64, scratch_operands = 3 : i64, tpu.core_type = #tpu.core_type<tc>, window_params = [{transform_indices = @transform_0, window_bounds = array<i64: 1, 16, 128>}, {pipeline_mode = #tpu.pipeline_mode<synchronous>, transform_indices = @transform_1, window_bounds = array<i64: 128, 384>}, {pipeline_mode = #tpu.pipeline_mode<synchronous>, transform_indices = @transform_2, window_bounds = array<i64: 128, 128>}, {pipeline_mode = #tpu.pipeline_mode<synchronous>, transform_indices = @transform_3, window_bounds = array<i64: 1, 128>}, {transform_indices = @transform_4, window_bounds = array<i64: 1, 8, 128>}]} {
    %c0_i32 = arith.constant 0 : i32
    %0 = arith.cmpi eq, %arg1, %c0_i32 : i32
    %1 = arith.extui %0 : i1 to i32
    %c0_i32_0 = arith.constant 0 : i32
    %2 = arith.cmpi ne, %1, %c0_i32_0 : i32
    scf.if %2 {
      %c0_19 = arith.constant 0 : index
      %c0_20 = arith.constant 0 : index
      %c0_21 = arith.constant 0 : index
      %31 = vector.load %arg2[%c0_19, %c0_20, %c0_21] : memref<1x16x128xf32, #tpu.memory_space<vmem>>, vector<1x16x128xf32>
      %32 = vector.shape_cast %31 : vector<1x16x128xf32> to vector<16x128xf32>
      %c0_22 = arith.constant 0 : index
      %c0_23 = arith.constant 0 : index
      %33 = vector.load %arg3[%c0_22, %c0_23] : memref<128x384xf32, #tpu.memory_space<vmem>>, vector<128x128xf32>
      %cst_24 = arith.constant dense<0.000000e+00> : vector<16x128xf32>
      %34 = tpu.matmul %32, %33, %cst_24 {dimension_numbers = #tpu.dot_dimension_numbers<[1], [0], [0], [1], [0, 0, 1, 1], [], []>} : vector<16x128xf32>, vector<128x128xf32>, vector<16x128xf32> -> vector<16x128xf32>
      %35 = vector.shape_cast %34 : vector<16x128xf32> to vector<16x2x64xf32>
      %36 = tpu.transpose %35, [1, 0, 2] : vector<16x2x64xf32> -> vector<2x16x64xf32>
      %c0_25 = arith.constant 0 : index
      %c0_26 = arith.constant 0 : index
      %c0_27 = arith.constant 0 : index
      %37 = vector.load %arg7[%c0_25, %c0_26, %c0_27] : memref<2x16x64xf32, #tpu.memory_space<vmem>>, vector<2x16x64xf32>
      tpu.vector_store %arg7[%c0_25, %c0_26, %c0_27], %36 {strides = array<i32>} : memref<2x16x64xf32, #tpu.memory_space<vmem>>, vector<2x16x64xf32>,
      %c0_28 = arith.constant 0 : index
      %c128 = arith.constant 128 : index
      %38 = vector.load %arg3[%c0_28, %c128] : memref<128x384xf32, #tpu.memory_space<vmem>>, vector<128x128xf32>
      %cst_29 = arith.constant dense<0.000000e+00> : vector<16x128xf32>
      %39 = tpu.matmul %32, %38, %cst_29 {dimension_numbers = #tpu.dot_dimension_numbers<[1], [0], [0], [1], [0, 0, 1, 1], [], []>} : vector<16x128xf32>, vector<128x128xf32>, vector<16x128xf32> -> vector<16x128xf32>
      %40 = vector.shape_cast %39 : vector<16x128xf32> to vector<16x2x64xf32>
      %41 = tpu.transpose %40, [1, 0, 2] : vector<16x2x64xf32> -> vector<2x16x64xf32>
      %c0_30 = arith.constant 0 : index
      %c0_31 = arith.constant 0 : index
      %c0_32 = arith.constant 0 : index
      %42 = vector.load %arg8[%c0_30, %c0_31, %c0_32] : memref<2x16x64xf32, #tpu.memory_space<vmem>>, vector<2x16x64xf32>
      tpu.vector_store %arg8[%c0_30, %c0_31, %c0_32], %41 {strides = array<i32>} : memref<2x16x64xf32, #tpu.memory_space<vmem>>, vector<2x16x64xf32>,
      %c0_33 = arith.constant 0 : index
      %c256 = arith.constant 256 : index
      %43 = vector.load %arg3[%c0_33, %c256] : memref<128x384xf32, #tpu.memory_space<vmem>>, vector<128x128xf32>
      %cst_34 = arith.constant dense<0.000000e+00> : vector<16x128xf32>
      %44 = tpu.matmul %32, %43, %cst_34 {dimension_numbers = #tpu.dot_dimension_numbers<[1], [0], [0], [1], [0, 0, 1, 1], [], []>} : vector<16x128xf32>, vector<128x128xf32>, vector<16x128xf32> -> vector<16x128xf32>
      %45 = vector.shape_cast %44 : vector<16x128xf32> to vector<16x2x64xf32>
      %46 = tpu.transpose %45, [1, 0, 2] : vector<16x2x64xf32> -> vector<2x16x64xf32>
      %c0_35 = arith.constant 0 : index
      %c0_36 = arith.constant 0 : index
      %c0_37 = arith.constant 0 : index
      %47 = vector.load %arg9[%c0_35, %c0_36, %c0_37] : memref<2x16x64xf32, #tpu.memory_space<vmem>>, vector<2x16x64xf32>
      tpu.vector_store %arg9[%c0_35, %c0_36, %c0_37], %46 {strides = array<i32>} : memref<2x16x64xf32, #tpu.memory_space<vmem>>, vector<2x16x64xf32>,
    } else {
    }
    %c8_i32 = arith.constant 8 : i32
    %3 = arith.muli %arg1, %c8_i32 : i32
    %4 = tpu.assume_multiple %3, 8 : i32
    %c0 = arith.constant 0 : index
    %5 = arith.index_cast %4 : i32 to index
    %c0_1 = arith.constant 0 : index
    %6 = vector.load %arg7[%c0, %5, %c0_1] : memref<2x16x64xf32, #tpu.memory_space<vmem>>, vector<2x8x64xf32>
    %c0_2 = arith.constant 0 : index
    %c0_3 = arith.constant 0 : index
    %c0_4 = arith.constant 0 : index
    %7 = vector.load %arg8[%c0_2, %c0_3, %c0_4] : memref<2x16x64xf32, #tpu.memory_space<vmem>>, vector<2x16x64xf32>
    %c0_5 = arith.constant 0 : index
    %c0_6 = arith.constant 0 : index
    %c0_7 = arith.constant 0 : index
    %8 = vector.load %arg9[%c0_5, %c0_6, %c0_7] : memref<2x16x64xf32, #tpu.memory_space<vmem>>, vector<2x16x64xf32>
    "tpu.trace_start"() <{level = 10 : i32, message = "hqd,hkd->hqk"}> : () -> ()
    %cst = arith.constant dense<0.000000e+00> : vector<2x8x16xf32>
    %9 = tpu.matmul %6, %7, %cst {dimension_numbers = #tpu.dot_dimension_numbers<[2], [2], [1], [1], [0, 0, 0, 1, 1, 1], [0], [0]>} : vector<2x8x64xf32>, vector<2x16x64xf32>, vector<2x8x16xf32> -> vector<2x8x16xf32>
    "tpu.trace_stop"() : () -> ()
    %cst_8 = arith.constant dense<0xFF800000> : vector<2x8xf32>
    %10 = vector.multi_reduction <maximumf>, %9, %cst_8 [2] : vector<2x8x16xf32> to vector<2x8xf32>
    %11 = vector.shape_cast %10 : vector<2x8xf32> to vector<2x8x1xf32>
    %12 = vector.broadcast %11 : vector<2x8x1xf32> to vector<2x8x16xf32>
    %13 = arith.subf %9, %12 : vector<2x8x16xf32>
    %14 = math.exp %13 : vector<2x8x16xf32>
    %cst_9 = arith.constant dense<0.000000e+00> : vector<2x8xf32>
    %15 = vector.multi_reduction <add>, %14, %cst_9 [2] : vector<2x8x16xf32> to vector<2x8xf32>
    %16 = vector.shape_cast %15 : vector<2x8xf32> to vector<2x8x1xf32>
    %17 = tpu.reciprocal %16 {approx = true} : vector<2x8x1xf32> -> vector<2x8x1xf32>
    %18 = vector.broadcast %17 : vector<2x8x1xf32> to vector<2x8x16xf32>
    %19 = arith.mulf %14, %18 : vector<2x8x16xf32>
    "tpu.trace_start"() <{level = 10 : i32, message = "hqk,hkd->qhd"}> : () -> ()
    %cst_10 = arith.constant dense<0.000000e+00> : vector<2x64x8xf32>
    %20 = tpu.matmul %8, %19, %cst_10 {dimension_numbers = #tpu.dot_dimension_numbers<[1], [2], [2], [1], [0, 0, 0, 2, 1, 1], [0], [0]>} : vector<2x16x64xf32>, vector<2x8x16xf32>, vector<2x64x8xf32> -> vector<2x64x8xf32>
    %21 = tpu.transpose %20, [2, 0, 1] : vector<2x64x8xf32> -> vector<8x2x64xf32>
    "tpu.trace_stop"() : () -> ()
    %22 = vector.shape_cast %21 : vector<8x2x64xf32> to vector<8x128xf32>
    %c0_11 = arith.constant 0 : index
    %c0_12 = arith.constant 0 : index
    %23 = vector.load %arg4[%c0_11, %c0_12] : memref<128x128xf32, #tpu.memory_space<vmem>>, vector<128x128xf32>
    %cst_13 = arith.constant dense<0.000000e+00> : vector<8x128xf32>
    %24 = tpu.matmul %22, %23, %cst_13 {dimension_numbers = #tpu.dot_dimension_numbers<[1], [0], [0], [1], [0, 0, 1, 1], [], []>} : vector<8x128xf32>, vector<128x128xf32>, vector<8x128xf32> -> vector<8x128xf32>
    %c0_14 = arith.constant 0 : index
    %c0_15 = arith.constant 0 : index
    %25 = vector.load %arg5[%c0_14, %c0_15] : memref<1x128xf32, #tpu.memory_space<vmem>>, vector<1x128xf32>
    %26 = vector.broadcast %25 : vector<1x128xf32> to vector<8x128xf32>
    %27 = arith.addf %24, %26 : vector<8x128xf32>
    %c0_16 = arith.constant 0 : index
    %c0_17 = arith.constant 0 : index
    %c0_18 = arith.constant 0 : index
    %28 = vector.load %arg6[%c0_16, %c0_17, %c0_18] : memref<1x8x128xf32, #tpu.memory_space<vmem>>, vector<1x8x128xf32>
    %29 = vector.shape_cast %28 : vector<1x8x128xf32> to vector<8x128xf32>
    %30 = vector.shape_cast %27 : vector<8x128xf32> to vector<1x8x128xf32>
    tpu.vector_store %arg6[%c0_16, %c0_17, %c0_18], %30 {strides = array<i32>} : memref<1x8x128xf32, #tpu.memory_space<vmem>>, vector<1x8x128xf32>,
    return
  }
  func.func @transform_0(%arg0: i32, %arg1: i32) -> (i32, i32, i32) {
    %c0_i32 = arith.constant 0 : i32
    %c0_i32_0 = arith.constant 0 : i32
    %c0_i32_1 = arith.constant 0 : i32
    return %arg0, %c0_i32, %c0_i32_0 : i32, i32, i32
  }
  func.func @transform_1(%arg0: i32, %arg1: i32) -> (i32, i32) {
    %c0_i32 = arith.constant 0 : i32
    %c0_i32_0 = arith.constant 0 : i32
    %c0_i32_1 = arith.constant 0 : i32
    return %c0_i32, %c0_i32_0 : i32, i32
  }
  func.func @transform_2(%arg0: i32, %arg1: i32) -> (i32, i32) {
    %c0_i32 = arith.constant 0 : i32
    %c0_i32_0 = arith.constant 0 : i32
    %c0_i32_1 = arith.constant 0 : i32
    return %c0_i32, %c0_i32_0 : i32, i32
  }
  func.func @transform_3(%arg0: i32, %arg1: i32) -> (i32, i32) {
    %c0_i32 = arith.constant 0 : i32
    %c0_i32_0 = arith.constant 0 : i32
    %c0_i32_1 = arith.constant 0 : i32
    return %c0_i32, %c0_i32_0 : i32, i32
  }
  func.func @transform_4(%arg0: i32, %arg1: i32) -> (i32, i32, i32) {
    %c0_i32 = arith.constant 0 : i32
    %c0_i32_0 = arith.constant 0 : i32
    return %arg0, %arg1, %c0_i32 : i32, i32, i32
  }
}

</mosaic_0001>

<bundles_post_ra>
// kernel: tpu_custom_call.1
= control target key start
LH: loop header
LB: loop body
LE: loop exit
PB: predicated region body
PF: predicated region fallthrough
CT: control target
= control target key end

     0   :  { %s3560_s0 = inlined_call_operand.hbm [shape: f32[2,16,128], index: 0, kind: input, shape index: {}]   ;;  %s3561_s1 = inlined_call_operand.hbm [shape: f32[128,384], index: 1, kind: input, shape index: {}]   ;;  %s3562_s2 = inlined_call_operand.hbm [shape: f32[128,128], index: 2, kind: input, shape index: {}]   ;;  %s3563_s3 = inlined_call_operand.vmem [shape: f32[1,128], index: 3, kind: input, shape index: {}]   ;;  %s3564_s4 = inlined_call_operand.hbm [shape: f32[2,16,128], index: 4, kind: output, shape index: {}]  }
   0x1   :  { %3577 = sst [smem:[#allocation19_spill]] %s3561_s1 }
   0x2   :  { %3578 = sst [smem:[#allocation20_spill]] %s3562_s2 }
   0x3   :  { %3579 = sst [smem:[#allocation21_spill]] %s3564_s4 }
   0x4   :  { %9 = vsyncpa [#allocation6], 0 }
   0x5   :  { %11 = vsyncpa [#allocation6 + $0x1], 0 }
   0x6   :  { %12 = vsyncpa [#allocation9], 0 }
   0x7   :  { %13 = vsyncpa [#allocation7], 0 }
   0x8   :  { %15 = vsyncpa [#allocation7 + $0x1], 0  ;;  %s3060_s15 = smov 0   ;;  %s3062_s16 = smov 0  }
   0x9   :  { %s3064_s17 = smov 0   ;;  %s3066_s18 = smov 0  }
   0xa   :  { %s3068_s19 = smov 0   ;;  %s3070_s20 = smov 0  }
   0xb   :  { %s3072_s21 = smov 0   ;;  %s3074_s22 = smov 0  }
   0xc   :  { %s3076_s23 = smov 0   ;;  %s3078_s24 = smov 0  }
   0xd   :  { %s3080_s25 = smov 0  }
   0xe LB: > { %3580 = sst [smem:[#allocation15_spill]] %s2975_s15  ;;  %s2192_s26 = sadd.s32 4294967295, %s3015_s25   ;;  %s3015_s25 = sphi %s3080_s25, %s21_s25   ;;  %s3011_s24 = sphi %s3078_s24, %s3615_s24   ;;  %s3007_s23 = sphi %s3076_s23, %s3607_s23   ;;  %s3003_s22 = sphi %s3074_s22, %s3614_s22   ;;  %s2999_s21 = sphi %s3072_s21, %s3606_s21   ;;  %s2995_s20 = sphi %s3070_s20, %s3613_s20   ;;  %s2991_s19 = sphi %s3068_s19, %s3612_s19   ;;  %s2987_s18 = sphi %s3066_s18, %s3611_s18   ;;  %s2983_s17 = sphi %s3064_s17, %s3610_s17   ;;  %s2979_s16 = sphi %s3062_s16, %s3609_s16   ;;  %s2975_s15 = sphi %s3060_s15, %s3608_s15  }
   0xf   : > { %3581 = sst [smem:[#allocation16_spill]] %s3007_s23  ;;  %s2193_s27 = sadd.s32 4294967294, %s3015_s25  }
  0x10   : > { %p53_p0 = scmp.ne.s32.totalorder %s2991_s19, %s2987_s18  ;;  %p3116_p1 = scmp.eq.s32.totalorder %s2192_s26, 0 }
  0x11   : > { %p141_p2 = scmp.ne.s32.totalorder %s2983_s17, %s2979_s16  ;;  %p142_p4 = scmp.eq.s32.totalorder %s2192_s26, 3 }
  0x12   : > { %s3582_s28 = scalar_select %p3116_p1, 1, 0 }
  0x13   : > { %p3125_p3 = por %p3116_p1, %p53_p0  ;;  %p147_p5 = scmp.ne.s32.totalorder %s2979_s16, %s2975_s15 }
  0x14   : > { %p148_p6 = scmp.eq.s32.totalorder %s2193_s27, 3  ;;  %p3131_p7 = por %p142_p4, %p141_p2 }
  0x15   : > { %s3583_s30 = scalar_select %p3125_p3, 1, 0 }
  0x16   : > { %s3584_s5 = scalar_select %p3131_p7, 1, 0 }
  0x17   : > { %p2194_p8 = scmp.ge.s32.totalorder %s3015_s25, 1  ;;  %p3136_p9 = por %p148_p6, %p147_p5 }
  0x18   : > { %p155_p10 = scmp.lt.s32.totalorder %s3015_s25, 5  ;;  %s3017_s8 = smov [#allocation8]  }
  0x19   : > { %s3585_s6 = scalar_select %p3136_p9, 1, 0 }
  0x1a   : > { %p3141_p11 = pnand %p2194_p8, %p155_p10  ;;  %s167_s9 = sshll.u32 %s3017_s8, 4  ;;  %s168_s9 = int_to_ptr.vmem [resolvable:$true] %s167_s9 }
  0x1b   : > { %3586 = sst [smem:[#allocation17_spill]] %s3585_s6  ;;  %s3018_s11 = smov [#allocation10]  }
  0x1c   : > { %s3587_s7 = scalar_select %p3141_p11, 1, 0 }
  0x1d   : > { %p2670_p12 = pneg %p3141_p11  ;;  %s180_s12 = sshll.u32 %s3018_s11, 4  ;;  %s3153_s12 = int_to_ptr.vmem [resolvable:$true] %s180_s12 }
  0x1e   : > { %s3589_s1 = sld [smem:[#allocation19_spill]] }
  0x1f   : > { %p3149_p13 = pnand %p2670_p12, %p3116_p1 }
  0x21   : > { %p2805_p2 = pneg %p3149_p13 }
  0x24   : > { %s2803_s18 = scalar_lea.hbm %s3589_s1, 6144 }
  0x25   : > { %p2804_p0 = scmp.ne.s32.totalorder %s3589_s1, %s2803_s18  ;;  %p2810_p6 = scmp.lt.u32.totalorder %s2803_s18, %s3589_s1 }
  0x27   : > { %p2806_p4 = pnand %p2805_p2, %p2804_p0 }
  0x29   : > { %p2807_p5 = pneg %p2806_p4 }
  0x2b   : > { %p2812_p8 = pnand %p2810_p6, %p2807_p5 }
  0x2d   : > { %2815 = shalt.err (!%p2812_p8)
}
  0x2e   : > { %s2816_s11 = scalar_lea.vmem %s168_s9, 6144  ;;  %p2824_p7 = scmp.lt.s32.totalorder %s168_s9, %s168_s9 }
  0x2f   : > { %p2817_p10 = scmp.ne.s32.totalorder %s168_s9, %s2816_s11  ;;  %p2825_p1 = scmp.lt.s32.totalorder %s2816_s11, %s2816_s11 }
  0x31   : > { %p2819_p12 = pnand %p2817_p10, %p2805_p2  ;;  %p2826_p3 = por %p2825_p1, %p2824_p7 }
  0x33   : > { %p2820_p9 = pneg %p2819_p12 }
  0x35   : > { %p2827_p11 = pnand %p2826_p3, %p2820_p9 }
  0x37   : > { %2830 = shalt.err (!%p2827_p11)
}
  0x38   : > { %s3019_s13 = smov 384   ;;  %s3020_s14 = smov 24  }
  0x39   : > { %2673 = dma.hbm_to_vmem [thread:$0]  (!%p3149_p13), %s3589_s1, 6144, %s168_s9, [#allocation9], %s3019_s13, %s3019_s13, %s3020_s14  }
  0x3a   : > { %s3590_s2 = sld [smem:[#allocation20_spill]] }
  0x40   : > { %s2831_s8 = scalar_lea.hbm %s3590_s2, 2048 }
  0x41   : > { %p2832_p0 = scmp.ne.s32.totalorder %s3590_s2, %s2831_s8  ;;  %p2838_p7 = scmp.lt.u32.totalorder %s2831_s8, %s3590_s2 }
  0x43   : > { %p2834_p1 = pnand %p2832_p0, %p2805_p2 }
  0x45   : > { %p2835_p3 = pneg %p2834_p1 }
  0x47   : > { %p2840_p9 = pnand %p2838_p7, %p2835_p3 }
  0x49   : > { %2843 = shalt.err (!%p2840_p9)
}
  0x4a   : > { %s2844_s9 = scalar_lea.vmem %s3153_s12, 2048  ;;  %p2852_p6 = scmp.lt.s32.totalorder %s3153_s12, %s3153_s12 }
  0x4b   : > { %p2845_p11 = scmp.ne.s32.totalorder %s3153_s12, %s2844_s9  ;;  %p2853_p8 = scmp.lt.s32.totalorder %s2844_s9, %s2844_s9 }
  0x4d   : > { %p2847_p4 = pnand %p2845_p11, %p2805_p2  ;;  %p2854_p10 = por %p2853_p8, %p2852_p6 }
  0x4f   : > { %p2848_p5 = pneg %p2847_p4 }
  0x51   : > { %p2855_p12 = pnand %p2854_p10, %p2848_p5 }
  0x53   : > { %2858 = shalt.err (!%p2855_p12)
}
  0x54   : > { %s3573_s4 = smov 128   ;;  %s3574_s15 = smov 8  }
  0x55   : > { %2676 = dma.hbm_to_vmem [thread:$0]  (!%p3149_p13), %s3590_s2, 2048, %s3153_s12, [#allocation9], %s3573_s4, %s3573_s4, %s3574_s15  }
  0x56   : > { %s30_s14 = sadd.s32 1, %s3007_s23  ;;  %s33_s29 = sadd.s32 1, %s3011_s24 }
  0x57   : > { %p31_p2 = scmp.ge.s32.totalorder %s30_s14, 2  ;;  %s40_s18 = sadd.s32 1, %s2995_s20 }
  0x58   : > { %p47_p0 = scmp.ne.s32.totalorder %s2995_s20, %s2991_s19  ;;  %p48_p1 = scmp.eq.s32.totalorder %s3015_s25, 0 }
  0x59   : > { %s3617_s14 = smov (%p31_p2, %s30_s14), 0  ;;  %s3619_s29 = smov (!%p31_p2, %s33_s29), %s3011_s24 }
  0x5a   : > { %3591 = sst [smem:[#allocation18_spill]] %s3617_s14  ;;  %p3214_p3 = por %p48_p1, %p47_p0 }
  0x5b   : > { %s127_s26 = ssub.s32 %s3007_s23, %s3617_s14  ;;  %p35_p13 = scmp.ge.s32.totalorder %s3619_s29, 2 }
  0x5c   : > { %p2687_p7 = scmp.lt.s32.totalorder %s3015_s25, 4  ;;  %s197_s12 = sand.u32 1, %s2995_s20  }
  0x5d   : > { %s2252_s27 = sshll.u32 %s3011_s24, 8  ;;  %s3621_s29 = smov (%p35_p13, %s3619_s29), 0 }
  0x5e   : > { %s2198_s8 = sshll.u32 %s197_s12, 4  ;;  %s37_s11 = ssub.s32 %s3011_s24, %s3621_s29 }
  0x5f   : > { %p38_p9 = scmp.eq.s32.totalorder %s37_s11, 0  ;;  %s128_s9 = sor.u32 %s127_s26, %s37_s11 }
  0x60   : > { %p129_p11 = scmp.eq.s32.totalorder %s128_s9, 0  ;;  %s3230_s4 = scalar_lea.hbm %s3560_s0, %s2252_s27 }
  0x61   : > { %s3233_s15 = scalar_select %p38_p9, %s2995_s20, %s40_s18  }
  0x62   : > { %s3593_s1 = sadd.s32 1, %s2983_s17  ;;  %s201_s14 = scalar_lea.vmem [#allocation5], %s2198_s8 }
  0x63   : > { %s3238_s2 = scalar_select %p129_p11, %s2983_s17, %s3593_s1  }
  0x64   : > { %s208_s23 = sshll.u32 %s201_s14, 4  ;;  %p3244_p4 = pnand %p2687_p7, %p3214_p3  ;;  %s3248_s23 = int_to_ptr.vmem [resolvable:$true] %s208_s23 }
  0x65   : > { %s3250_s27 = scalar_lea.sflag [#allocation6], %s197_s12  ;;  %s2859_s18 = scalar_lea.hbm %s3230_s4, 256 }
  0x66   : > { %p2860_p5 = scmp.ne.s32.totalorder %s3230_s4, %s2859_s18  ;;  %p2861_p6 = pneg %p3244_p4 }
  0x67   : > { %s2864_s10 = scalar_lea.hbm %s3560_s0, 512  ;;  %p2865_p12 = scmp.lt.u32.totalorder %s3230_s4, %s3560_s0 }
  0x68   : > { %p2862_p8 = pnand %p2861_p6, %p2860_p5  ;;  %p2866_p2 = scmp.lt.u32.totalorder %s2864_s10, %s2859_s18 }
  0x69   : > { %p2868_p1 = scmp.lt.u32.totalorder %s2859_s18, %s3230_s4 }
  0x6a   : > { %p2863_p10 = pneg %p2862_p8  ;;  %p2867_p0 = por %p2866_p2, %p2865_p12 }
  0x6c   : > { %p2869_p3 = por %p2868_p1, %p2867_p0 }
  0x6e   : > { %p2870_p13 = pnand %p2869_p3, %p2863_p10 }
  0x70   : > { %2873 = shalt.err (!%p2870_p13)
}
  0x71   : > { %s2874_s12 = scalar_lea.vmem %s3248_s23, 256  ;;  %s3023_s9 = smov [#allocation5]  }
  0x72   : > { %p2875_p7 = scmp.ne.s32.totalorder %s3248_s23, %s2874_s12  ;;  %s2879_s6 = sshll.u32 %s3023_s9, 4  ;;  %s2880_s6 = int_to_ptr.vmem [resolvable:$false] %s2879_s6 }
  0x73   : > { %s2881_s13 = scalar_lea.vmem %s2880_s6, 512  ;;  %p2882_p5 = scmp.lt.s32.totalorder %s3248_s23, %s2880_s6 }
  0x74   : > { %p2877_p9 = pnand %p2875_p7, %p2861_p6  ;;  %p2883_p8 = scmp.lt.s32.totalorder %s2881_s13, %s2874_s12 }
  0x76   : > { %p2878_p11 = pneg %p2877_p9  ;;  %p2884_p12 = por %p2883_p8, %p2882_p5 }
  0x78   : > { %p2885_p2 = pnand %p2884_p12, %p2878_p11 }
  0x7a   : > { %2888 = shalt.err (!%p2885_p2)
}
  0x7b   : > { %s3595_s18 = smov 8   ;;  %s3596_s1 = smov 128  }
  0x7c   : > { %2680 = dma.hbm_to_vmem [thread:$0]  (!%p3244_p4), %s3230_s4, 256, %s3248_s23, %s3250_s27, %s3596_s1, %s3596_s1, %s3595_s18  }
  0x7d   : > { %p3597_p6 = scmp.ne.s32.totalorder %s3587_s7, 0 }
  0x7e   : > { %s222_s14 = sand.u32 (!%p3597_p6), 1, %s2991_s19   ;;  %p3598_p10 = scmp.ne.s32.totalorder (!%p3597_p6), %s3583_s30, 0 }
  0x7f   : > { %220 = sbr.rel (%p3597_p6) target bundleno = 1830 (0x726), region = 36  ;;  %s3284_s10 = sshll.u32 (!%p3597_p6), %s222_s14, 4 }
  0x80   : > { %s223_s8 = scalar_lea.sflag (!%p3597_p6), [#allocation6], %s222_s14  ;;  %s226_s11 = scalar_lea.vmem (!%p3597_p6), [#allocation5], %s3284_s10 }
  0x86   : > { %2962 = dma.done.wait (%p3598_p10), %s223_s8, 256  }
  0x87   : > { %2964 = vsyncadd (%p3598_p10), %s223_s8, 4294967040  ;;  %p3599_p0 = scmp.ne.s32.totalorder %s3582_s28, 0 }
  0x89   : > { %2966 = dma.done.wait (%p3599_p0), [#allocation9], 8192  }
  0x8a   : > { %2968 = vsyncadd (%p3599_p0), [#allocation9], 4294959104  ;;  %s256_s23 = sand.u32 1, %s2979_s16   ;;  %p2206_p4 = scmp.ne.s32.totalorder %s2999_s21, 0 }
  0x8b   : > { %s3298_s7 = sshll.u32 %s256_s23, 3  ;;  %v265_v0 = vld [vmem:[#allocation8] sm:$0xff] (!%p2206_p4)  ;;  %v266_v1 = vld [vmem:[#allocation8 + $0x18] sm:$0xff] (!%p2206_p4)  ;;  %v601_v2 = vld [vmem:[#allocation8 + $0x8] sm:$0xff] (!%p2206_p4)  ;;  %s3024_s28 = smov (!%p2206_p4), 64   ;;  %vm596_vm0 = vcmask (!%p2206_p4), 523264  }
  0x8c   : > { %s258_s4 = scalar_lea.vmem [#allocation11], %s3298_s7  ;;  %262 = sbr.rel (%p2206_p4) target bundleno = 553 (0x229), region = 52  ;;  %v2530_v3 = vpack.c.bf16 (!%p2206_p4), %v266_v1, %v265_v0  ;;  %v602_v4 = vld [vmem:[#allocation8 + $0x20] sm:$0xff] (!%p2206_p4)  ;;  %v267_v5 = vld [vmem:[#allocation8 + $0x30] sm:$0xff] (!%p2206_p4)  ;;  %v268_v6 = vld [vmem:[#allocation8 + $0x48] sm:$0xff] (!%p2206_p4) }
  0x8d   : > { %v2562_v7 = vpack.c.bf16 (!%p2206_p4), %v602_v4, %v601_v2  ;;  %v2534_v8 = vpack.c.bf16 (!%p2206_p4), %v268_v6, %v267_v5  ;;  %v603_v9 = vld [vmem:[#allocation8 + $0x38] sm:$0xff] (!%p2206_p4)  ;;  %v604_v10 = vld [vmem:[#allocation8 + $0x50] sm:$0xff] (!%p2206_p4)  ;;  %v269_v11 = vld [vmem:[#allocation8 + $0x60] sm:$0xff] (!%p2206_p4) }
  0x8e   : > { %2531 = vmatprep.subr.bf16.mxu0 (!%p2206_p4), %v2530_v3  ;;  %v2566_v12 = vpack.c.bf16 (!%p2206_p4), %v604_v10, %v603_v9  ;;  %v270_v13 = vld [vmem:[#allocation8 + $0x78] sm:$0xff] (!%p2206_p4)  ;;  %v605_v14 = vld [vmem:[#allocation8 + $0x68] sm:$0xff] (!%p2206_p4)  ;;  %v606_v15 = vld [vmem:[#allocation8 + $0x80] sm:$0xff] (!%p2206_p4) }
  0x8f   : > { %2563 = vmatprep.subr.bf16.mxu1 (!%p2206_p4), %v2562_v7  ;;  %2533 = vmatpush3.bf16.msra.mxu0 (!%p2206_p4), %v2530_v3  ;;  %v2538_v16 = vpack.c.bf16 (!%p2206_p4), %v270_v13, %v269_v11  ;;  %v2570_v17 = vpack.c.bf16 (!%p2206_p4), %v606_v15, %v605_v14  ;;  %v271_v18 = vld [vmem:[#allocation8 + $0x90] sm:$0xff] (!%p2206_p4)  ;;  %v272_v19 = vld [vmem:[#allocation8 + $0xa8] sm:$0xff] (!%p2206_p4)  ;;  %v607_v20 = vld [vmem:[#allocation8 + $0x98] sm:$0xff] (!%p2206_p4) }
  0x90   : > { %2565 = vmatpush3.bf16.msra.mxu1 (!%p2206_p4), %v2562_v7  ;;  %2535 = vmatprep.subr.bf16.mxu0 (!%p2206_p4), %v2534_v8  ;;  %v608_v21 = vld [vmem:[#allocation8 + $0xb0] sm:$0xff] (!%p2206_p4)  ;;  %v2542_v22 = vpack.c.bf16 (!%p2206_p4), %v272_v19, %v271_v18  ;;  %v273_v24 = vld [vmem:[#allocation8 + $0xc0] sm:$0xff] (!%p2206_p4)  ;;  %v274_v25 = vld [vmem:[#allocation8 + $0xd8] sm:$0xff] (!%p2206_p4)  ;;  %v368_v18 = vlaneseq (!%p2206_p4) }
  0x91   : > { %2567 = vmatprep.subr.bf16.mxu1 (!%p2206_p4), %v2566_v12  ;;  %v2574_v23 = vpack.c.bf16 (!%p2206_p4), %v608_v21, %v607_v20  ;;  %v263_v26 = vld [vmem:[%s226_s11] sm:$0xff] (!%p2206_p4)  ;;  %v609_v27 = vld [vmem:[#allocation8 + $0xc8] sm:$0xff] (!%p2206_p4)  ;;  %v2546_v29 = vpack.c.bf16 (!%p2206_p4), %v274_v25, %v273_v24  ;;  %v611_v33 = vld [vmem:[#allocation8 + $0xf8] sm:$0xff] (!%p2206_p4)  ;;  %v3026_v21 = vmov (!%p2206_p4), 1934713408   ;;  %v3027_v25 = vmov (!%p2206_p4), 0.0  }
  0x92   : > { %v610_v28 = vld [vmem:[#allocation8 + $0xe0] sm:$0xff] (!%p2206_p4)  ;;  %2380 = vmatprep.mubr.f32.mxu0 (!%p2206_p4), %v263_v26  ;;  %2415 = vmatprep.mubr.f32.mxu1 (!%p2206_p4), %v263_v26  ;;  %v275_v31 = vld [vmem:[#allocation8 + $0xf0] sm:$0xff] (!%p2206_p4)  ;;  %v276_v32 = vld [vmem:[#allocation8 + $0x108] sm:$0xff] (!%p2206_p4)  ;;  %v369_v20 = vshrl.u32 (!%p2206_p4), %v368_v18, 7 }
  0x93   : > { %2537 = vmatpush3.bf16.msra.mxu0 %v2534_v8  ;;  %v2578_v30 = vpack.c.bf16 %v610_v28, %v609_v27  ;;  %v612_v34 = vld [vmem:[#allocation8 + $0x110] sm:$0xff]  ;;  %v2550_v35 = vpack.c.bf16 %v276_v32, %v275_v31  ;;  %v277_v37 = vld [vmem:[#allocation8 + $0x120] sm:$0xff]  ;;  %v278_v38 = vld [vmem:[#allocation8 + $0x138] sm:$0xff] }
  0x94   : > { %2569 = vmatpush3.bf16.msra.mxu1 %v2566_v12  ;;  %2539 = vmatprep.subr.bf16.mxu0 %v2538_v16  ;;  %v2582_v36 = vpack.c.bf16 %v612_v34, %v611_v33  ;;  %v613_v39 = vld [vmem:[#allocation8 + $0x128] sm:$0xff]  ;;  %v614_v40 = vld [vmem:[#allocation8 + $0x140] sm:$0xff]  ;;  %v2554_v41 = vpack.c.bf16 %v278_v38, %v277_v37  ;;  %v279_v43 = vld [vmem:[#allocation8 + $0x150] sm:$0xff] }
  0x95   : > { %2571 = vmatprep.subr.bf16.mxu1 %v2570_v17  ;;  %v2586_v42 = vpack.c.bf16 %v614_v40, %v613_v39  ;;  %v280_v44 = vld [vmem:[#allocation8 + $0x168] sm:$0xff]  ;;  %v615_v45 = vld [vmem:[#allocation8 + $0x158] sm:$0xff]  ;;  %v616_v46 = vld [vmem:[#allocation8 + $0x170] sm:$0xff] }
  0x96   : > { %v2558_v47 = vpack.c.bf16 %v280_v44, %v279_v43  ;;  %v2590_v48 = vpack.c.bf16 %v616_v46, %v615_v45  ;;  %v936_v49 = vld [vmem:[#allocation8 + $0x10] sm:$0xff]  ;;  %v937_v50 = vld [vmem:[#allocation8 + $0x28] sm:$0xff]  ;;  %v938_v52 = vld [vmem:[#allocation8 + $0x40] sm:$0xff] }
  0x97   : > { %2541 = vmatpush3.bf16.msra.mxu0 %v2538_v16  ;;  %v2594_v51 = vpack.c.bf16 %v937_v50, %v936_v49  ;;  %v939_v53 = vld [vmem:[#allocation8 + $0x58] sm:$0xff]  ;;  %v940_v56 = vld [vmem:[#allocation8 + $0x70] sm:$0xff]  ;;  %v941_v57 = vld [vmem:[#allocation8 + $0x88] sm:$0xff]  ;;  %v3025_v16 = vmov 1983009808  }
  0x98   : > { %2573 = vmatpush3.bf16.msra.mxu1 %v2570_v17  ;;  %2543 = vmatprep.subr.bf16.mxu0 %v2542_v22  ;;  %v264_v54 = vld [vmem:[%s226_s11 + $0x8] sm:$0xff]  ;;  %v2598_v55 = vpack.c.bf16 %v939_v53, %v938_v52  ;;  %v2602_v58 = vpack.c.bf16 %v941_v57, %v940_v56  ;;  %v942_v59 = vld [vmem:[#allocation8 + $0xa0] sm:$0xff]  ;;  %v944_v62 = vld [vmem:[#allocation8 + $0xd0] sm:$0xff]  ;;  %v366_v17 = vunpack.c.l.s4 %v3025_v16 }
  0x99   : > { %2575 = vmatprep.subr.bf16.mxu1 %v2574_v23  ;;  %v943_v60 = vld [vmem:[#allocation8 + $0xb8] sm:$0xff]  ;;  %v945_v63 = vld [vmem:[#allocation8 + $0xe8] sm:$0xff]  ;;  %v946_v1 = vld [vmem:[#allocation8 + $0x100] sm:$0xff] }
  0x9a   : > { %v2606_v61 = vpack.c.bf16 %v943_v60, %v942_v59  ;;  %v2610_v0 = vpack.c.bf16 %v945_v63, %v944_v62  ;;  %v947_v2 = vld [vmem:[#allocation8 + $0x118] sm:$0xff]  ;;  %v948_v4 = vld [vmem:[#allocation8 + $0x130] sm:$0xff]  ;;  %v949_v5 = vld [vmem:[#allocation8 + $0x148] sm:$0xff]  ;;  %v367_v19 = vunpack.c.0.s8 %v366_v17 }
  0x9b   : > { %2545 = vmatpush3.bf16.msra.mxu0 %v2542_v22  ;;  %v2614_v3 = vpack.c.bf16 %v947_v2, %v946_v1  ;;  %v2618_v6 = vpack.c.bf16 %v949_v5, %v948_v4  ;;  %v950_v7 = vld [vmem:[#allocation8 + $0x160] sm:$0xff]  ;;  %v951_v8 = vld [vmem:[#allocation8 + $0x178] sm:$0xff]  ;;  %v397_v22 = vunpack.c.l.s4 %v3026_v21 }
  0x9c   : > { %2577 = vmatpush3.bf16.msra.mxu1 %v2574_v23  ;;  %2547 = vmatprep.subr.bf16.mxu0 %v2546_v29  ;;  %v2622_v9 = vpack.c.bf16 %v951_v8, %v950_v7  ;;  %v3312_v23 = vsub.s32 %v367_v19, %v369_v20 }
  0x9d   : > { %2579 = vmatprep.subr.bf16.mxu1 %v2578_v30  ;;  %v398_v24 = vunpack.c.0.s8 %v397_v22 }
  0x9f   : > { %2549 = vmatpush3.bf16.msra.mxu0 %v2546_v29  ;;  %v3320_v32 = vsub.s32 %v398_v24, %v369_v20 }
  0xa0   : > { %2581 = vmatpush3.bf16.msra.mxu1 %v2578_v30  ;;  %2551 = vmatprep.subr.bf16.mxu0 %v2550_v35 }
  0xa1   : > { %2583 = vmatprep.subr.bf16.mxu1 %v2582_v36 }
  0xa3   : > { %2553 = vmatpush3.bf16.msra.mxu0 %v2550_v35 }
  0xa4   : > { %2585 = vmatpush3.bf16.msra.mxu1 %v2582_v36  ;;  %2555 = vmatprep.subr.bf16.mxu0 %v2554_v41 }
  0xa5   : > { %2587 = vmatprep.subr.bf16.mxu1 %v2586_v42 }
  0xa7   : > { %2557 = vmatpush3.bf16.msra.mxu0 %v2554_v41 }
  0xa8   : > { %2589 = vmatpush3.bf16.msra.mxu1 %v2586_v42  ;;  %2559 = vmatprep.subr.bf16.mxu0 %v2558_v47 }
  0xa9   : > { %2591 = vmatprep.subr.bf16.mxu1 %v2590_v48 }
  0xab   : > { %2561 = vmatpush3.bf16.msra.mxu0 %v2558_v47 }
  0xac   : > { %2593 = vmatpush3.bf16.msra.mxu1 %v2590_v48  ;;  %2595 = vmatprep.subr.bf16.mxu0 %v2594_v51 }
  0xae   : > { %2381 = vmatmul.mubr.f32.vlgmr.msra.gmra.mrb[0].mxu0 %v264_v54 }
  0xaf   : > { %2416 = vmatmul.mubr.f32.vlgmr.msra.gmra.mrb[0].mxu1 %v264_v54  ;;  %2597 = vmatpush3.bf16.msra.mxu0 %v2594_v51 }
  0xb0   : > { %2599 = vmatprep.subr.bf16.mxu0 %v2598_v55  ;;  %2450 = vmatprep.mubr.f32.mxu0 %v263_v26 }
  0xb3   : > { %2601 = vmatpush3.bf16.msra.mxu0 %v2598_v55 }
  0xb4   : > { %2603 = vmatprep.subr.bf16.mxu0 %v2602_v58 }
  0xb7   : > { %2605 = vmatpush3.bf16.msra.mxu0 %v2602_v58 }
  0xb8   : > { %2607 = vmatprep.subr.bf16.mxu0 %v2606_v61 }
  0xbb   : > { %2609 = vmatpush3.bf16.msra.mxu0 %v2606_v61 }
  0xbc   : > { %2611 = vmatprep.subr.bf16.mxu0 %v2610_v0 }
  0xbf   : > { %2613 = vmatpush3.bf16.msra.mxu0 %v2610_v0 }
  0xc0   : > { %2615 = vmatprep.subr.bf16.mxu0 %v2614_v3 }
  0xc3   : > { %2617 = vmatpush3.bf16.msra.mxu0 %v2614_v3 }
  0xc4   : > { %2619 = vmatprep.subr.bf16.mxu0 %v2618_v6 }
  0xc7   : > { %2621 = vmatpush3.bf16.msra.mxu0 %v2618_v6 }
  0xc8   : > { %2623 = vmatprep.subr.bf16.mxu0 %v2622_v9 }
  0xcb   : > { %2625 = vmatpush3.bf16.msra.mxu0 %v2622_v9 }
  0xce   : > { %2451 = vmatmul.mubr.f32.vlgmr.msra.gmra.mrb[2].mxu0 %v264_v54 }
 0x181   : > { %v2382_v10 = vpop.f32.mrb[0].mxu0 }
 0x182   : > { %v2417_v11 = vpop.f32.mrb[0].mxu1  ;;  %360 = vrot.lane.b32.xlu0 %v2382_v10, %s3024_s28  ;;  %v347_v12 = vpop.f32.mrb[1].mxu0  ;;  %v430_v26 = vcombine.high %v2382_v10, %v3027_v25  ;;  %v437_v29 = vrot.slane %v2382_v10, %v3312_v23 }
 0x183   : > { %696 = vrot.lane.b32.xlu1 %v2417_v11, %s3024_s28  ;;  %v683_v13 = vpop.f32.mrb[1].mxu1  ;;  %v766_v27 = vcombine.high %v2417_v11, %v3027_v25  ;;  %v364_v28 = vcombine.high %v347_v12, %v3027_v25  ;;  %v773_v30 = vrot.slane %v2417_v11, %v3312_v23  ;;  %v3324_v35 = vrot.slane %v347_v12, %v3312_v23 }
 0x184   : > { %v700_v31 = vcombine.high %v683_v13, %v3027_v25  ;;  %v444_v34 = vrot.slane %v430_v26, %v3312_v23  ;;  %v707_v40 = vrot.slane %v683_v13, %v3312_v23 }
 0x185   : > { %v780_v39 = vrot.slane %v766_v27, %v3312_v23  ;;  %v3333_v43 = vrot.slane %v364_v28, %v3312_v23 }
 0x186   : > { %358 = vrot.lane.b32.xlu0 %v347_v12, %s3024_s28  ;;  %v714_v47 = vrot.slane %v700_v31, %v3312_v23 }
 0x187   : > { %694 = vrot.lane.b32.xlu1 %v683_v13, %s3024_s28 }
 0x1a1   : > { %v3306_v14 = vpop.f32.mrb[2].mxu0 }
 0x1a2   : > { %1031 = vrot.lane.b32.xlu1 %v3306_v14, %s3024_s28  ;;  %v3309_v15 = vpop.f32.mrb[3].mxu0 }
 0x1a3   : > { %1029 = vrot.lane.b32.xlu0 %v3309_v15, %s3024_s28 }
 0x1f4   : > { %v361_v33 = vpop.permute.xlu0 %360 }
 0x1f5   : > { %v697_v36 = vpop.permute.xlu1 %696  ;;  %v445_v37 = vcombine.high %v361_v33, %v3027_v25  ;;  %v452_v38 = vrot.slane %v361_v33, %v3312_v23 }
 0x1f6   : > { %v781_v41 = vcombine.high %v697_v36, %v3027_v25  ;;  %v788_v42 = vrot.slane %v697_v36, %v3312_v23 }
 0x1f7   : > { %v459_v44 = vrot.slane %v445_v37, %v3312_v23  ;;  %v460_v45 = vcombine.low %v437_v29, %v452_v38  ;;  %v461_v46 = vcombine.high %v437_v29, %v452_v38 }
 0x1f8   : > { %v795_v48 = vrot.slane %v781_v41, %v3312_v23  ;;  %v796_v49 = vcombine.low %v773_v30, %v788_v42  ;;  %v797_v50 = vcombine.high %v773_v30, %v788_v42  ;;  %v359_v12 = vpop.permute.xlu0 %358 }
 0x1f9   : > { %v468_v51 = vrot.slane %v460_v45, %v3320_v32  ;;  %v475_v52 = vrot.slane %v461_v46, %v3320_v32  ;;  %v476_v53 = vcombine.low %v444_v34, %v459_v44  ;;  %v477_v54 = vcombine.high %v444_v34, %v459_v44  ;;  %v695_v3 = vpop.permute.xlu1 %694 }
 0x1fa   : > { %v804_v55 = vrot.slane %v796_v49, %v3320_v32  ;;  %v811_v56 = vrot.slane %v797_v50, %v3320_v32  ;;  %v812_v57 = vcombine.low %v780_v39, %v795_v48  ;;  %v813_v58 = vcombine.high %v780_v39, %v795_v48 }
 0x1fb   : > { %v484_v59 = vrot.slane %v476_v53, %v3320_v32  ;;  %v491_v60 = vrot.slane %v477_v54, %v3320_v32  ;;  %v546_v61 = vcombine.low %v468_v51, %v475_v52  ;;  %v2209_v62 = vcombine.high %v468_v51, %v475_v52 }
 0x1fc   : > { %v820_v63 = vrot.slane %v812_v57, %v3320_v32  ;;  %v827_v0 = vrot.slane %v813_v58, %v3320_v32  ;;  %v882_v1 = vcombine.low %v804_v55, %v811_v56  ;;  %v2213_v2 = vcombine.high %v804_v55, %v811_v56 }
 0x1fd   : > { %v553_v4 = vrot.slane %v546_v61, %v3312_v23  ;;  %v561_v5 = vrot.slane %v2209_v62, %v3312_v23  ;;  %v562_v6 = vcombine.low %v484_v59, %v491_v60  ;;  %v2210_v7 = vcombine.high %v484_v59, %v491_v60 }
 0x1fe   : > { %v889_v8 = vrot.slane %v882_v1, %v3312_v23  ;;  %v897_v9 = vrot.slane %v2213_v2, %v3312_v23  ;;  %v898_v10 = vcombine.low %v820_v63, %v827_v0  ;;  %v2214_v11 = vcombine.high %v820_v63, %v827_v0 }
 0x1ff   : > { %v569_v13 = vrot.slane %v562_v6, %v3312_v23  ;;  %v577_v16 = vrot.slane %v2210_v7, %v3312_v23  ;;  %v578_v17 = vcombine.low %v553_v4, %v561_v5  ;;  %v715_v18 = vcombine.high %v695_v3, %v3027_v25 }
 0x200   : > { %v905_v19 = vrot.slane %v898_v10, %v3312_v23  ;;  %v913_v20 = vrot.slane %v2214_v11, %v3312_v23  ;;  %v914_v21 = vcombine.low %v889_v8, %v897_v9  ;;  %v722_v22 = vrot.slane %v695_v3, %v3312_v23 }
 0x201   : > { %v585_v24 = vrot.slane %v578_v17, %v3320_v32  ;;  %v586_v26 = vcombine.low %v569_v13, %v577_v16  ;;  %v729_v27 = vrot.slane %v715_v18, %v3312_v23  ;;  %v379_v28 = vcombine.high %v359_v12, %v3027_v25 }
 0x202   : > { %v921_v29 = vrot.slane %v914_v21, %v3320_v32  ;;  %v922_v30 = vcombine.low %v905_v19, %v913_v20  ;;  %v730_v31 = vcombine.low %v707_v40, %v722_v22  ;;  %v731_v33 = vcombine.high %v707_v40, %v722_v22 }
 0x203   : > { %v593_v34 = vrot.slane %v586_v26, %v3320_v32  ;;  %v746_v36 = vcombine.low %v714_v47, %v729_v27  ;;  %v747_v37 = vcombine.high %v714_v47, %v729_v27  ;;  %v386_v38 = vrot.slane %v359_v12, %v3312_v23 }
 0x204   : > { %v929_v39 = vrot.slane %v922_v30, %v3320_v32  ;;  %v738_v41 = vrot.slane %v730_v31, %v3320_v32  ;;  %v745_v42 = vrot.slane %v731_v33, %v3320_v32  ;;  %v393_v44 = vrot.slane %v379_v28, %v3312_v23 }
 0x205   : > { %v594_v45 = vcombine.low %v585_v24, %v593_v34  ;;  %v595_v46 = vcombine.high %v585_v24, %v593_v34  ;;  %v754_v48 = vrot.slane %v746_v36, %v3320_v32  ;;  %v761_v40 = vrot.slane %v747_v37, %v3320_v32 }
 0x206   : > { %v930_v49 = vcombine.low %v921_v29, %v929_v39  ;;  %v931_v50 = vcombine.high %v921_v29, %v929_v39  ;;  %v832_v51 = vcombine.low %v738_v41, %v745_v42  ;;  %v2211_v47 = vcombine.high %v738_v41, %v745_v42 }
 0x207   : > { %598 = vst.msk [vmem:[#allocation2 + $0x8] sm:$0xff] %vm596_vm0, %v594_v45  ;;  %600 = vst.msk [vmem:[#allocation2 + $0x18] sm:$0xff] %vm596_vm0, %v595_v46  ;;  %v848_v52 = vcombine.low %v754_v48, %v761_v40  ;;  %v2212_v53 = vcombine.high %v754_v48, %v761_v40  ;;  %v394_v54 = vcombine.low %v3324_v35, %v386_v38 }
 0x208   : > { %v395_v55 = vcombine.high %v3324_v35, %v386_v38  ;;  %933 = vst.msk [vmem:[#allocation3 + $0x8] sm:$0xff] %vm596_vm0, %v930_v49  ;;  %935 = vst.msk [vmem:[#allocation3 + $0x18] sm:$0xff] %vm596_vm0, %v931_v50  ;;  %v839_v56 = vrot.slane %v832_v51, %v3312_v23  ;;  %v847_v57 = vrot.slane %v2211_v47, %v3312_v23 }
 0x209   : > { %v410_v58 = vcombine.low %v3333_v43, %v393_v44  ;;  %v411_v59 = vcombine.high %v3333_v43, %v393_v44  ;;  %v855_v60 = vrot.slane %v848_v52, %v3312_v23  ;;  %v863_v61 = vrot.slane %v2212_v53, %v3312_v23 }
 0x20a   : > { %v402_v62 = vrot.slane %v394_v54, %v3320_v32  ;;  %v409_v35 = vrot.slane %v395_v55, %v3320_v32  ;;  %v864_v63 = vcombine.low %v839_v56, %v847_v57  ;;  %v1101_v20 = vcombine.high %v3306_v14, %v3027_v25 }
 0x20b   : > { %v418_v0 = vrot.slane %v410_v58, %v3320_v32  ;;  %v425_v1 = vrot.slane %v411_v59, %v3320_v32  ;;  %v872_v2 = vcombine.low %v855_v60, %v863_v61  ;;  %v1035_v21 = vcombine.high %v3309_v15, %v3027_v25 }
 0x20c   : > { %v496_v3 = vcombine.low %v402_v62, %v409_v35  ;;  %v2207_v4 = vcombine.high %v402_v62, %v409_v35  ;;  %v871_v43 = vrot.slane %v864_v63, %v3320_v32  ;;  %v1108_v27 = vrot.slane %v3306_v14, %v3312_v23 }
 0x20d   : > { %v512_v5 = vcombine.low %v418_v0, %v425_v1  ;;  %v2208_v6 = vcombine.high %v418_v0, %v425_v1  ;;  %v879_v7 = vrot.slane %v872_v2, %v3320_v32  ;;  %v1042_v31 = vrot.slane %v3309_v15, %v3312_v23 }
 0x20e   : > { %v503_v8 = vrot.slane %v496_v3, %v3312_v23  ;;  %v511_v9 = vrot.slane %v2207_v4, %v3312_v23  ;;  %v1115_v36 = vrot.slane %v1101_v20, %v3312_v23  ;;  %v1049_v39 = vrot.slane %v1035_v21, %v3312_v23 }
 0x20f   : > { %v519_v10 = vrot.slane %v512_v5, %v3312_v23  ;;  %v527_v11 = vrot.slane %v2208_v6, %v3312_v23  ;;  %v880_v12 = vcombine.low %v871_v43, %v879_v7  ;;  %v881_v13 = vcombine.high %v871_v43, %v879_v7 }
 0x210   : > { %v528_v16 = vcombine.low %v503_v8, %v511_v9 }
 0x211   : > { %v536_v17 = vcombine.low %v519_v10, %v527_v11  ;;  %932 = vst.msk [vmem:[#allocation3] sm:$0xff] %vm596_vm0, %v880_v12  ;;  %934 = vst.msk [vmem:[#allocation3 + $0x10] sm:$0xff] %vm596_vm0, %v881_v13 }
 0x212   : > { %v535_v18 = vrot.slane %v528_v16, %v3320_v32 }
 0x213   : > { %v543_v19 = vrot.slane %v536_v17, %v3320_v32 }
 0x214   : > { %v1032_v26 = vpop.permute.xlu1 %1031 }
 0x215   : > { %v544_v22 = vcombine.low %v535_v18, %v543_v19  ;;  %v545_v24 = vcombine.high %v535_v18, %v543_v19  ;;  %v1116_v28 = vcombine.high %v1032_v26, %v3027_v25  ;;  %v1123_v29 = vrot.slane %v1032_v26, %v3312_v23  ;;  %v1030_v30 = vpop.permute.xlu0 %1029 }
 0x216   : > { %v1050_v33 = vcombine.high %v1030_v30, %v3027_v25  ;;  %v1057_v34 = vrot.slane %v1030_v30, %v3312_v23 }
 0x217   : > { %597 = vst.msk [vmem:[#allocation2] sm:$0xff] %vm596_vm0, %v544_v22  ;;  %599 = vst.msk [vmem:[#allocation2 + $0x10] sm:$0xff] %vm596_vm0, %v545_v24  ;;  %v1130_v14 = vrot.slane %v1116_v28, %v3312_v23  ;;  %v1131_v37 = vcombine.low %v1108_v27, %v1123_v29  ;;  %v1132_v38 = vcombine.high %v1108_v27, %v1123_v29 }
 0x218   : > { %v1064_v41 = vrot.slane %v1050_v33, %v3312_v23  ;;  %v1065_v42 = vcombine.low %v1042_v31, %v1057_v34  ;;  %v1066_v15 = vcombine.high %v1042_v31, %v1057_v34 }
 0x219   : > { %v1139_v44 = vrot.slane %v1131_v37, %v3320_v32  ;;  %v1146_v45 = vrot.slane %v1132_v38, %v3320_v32  ;;  %v1147_v46 = vcombine.low %v1115_v36, %v1130_v14  ;;  %v1148_v25 = vcombine.high %v1115_v36, %v1130_v14 }
 0x21a   : > { %v1073_v48 = vrot.slane %v1065_v42, %v3320_v32  ;;  %v1080_v40 = vrot.slane %v1066_v15, %v3320_v32  ;;  %v1081_v49 = vcombine.low %v1049_v39, %v1064_v41  ;;  %v1082_v50 = vcombine.high %v1049_v39, %v1064_v41 }
 0x21b   : > { %v1155_v51 = vrot.slane %v1147_v46, %v3320_v32  ;;  %v1162_v47 = vrot.slane %v1148_v25, %v3320_v32  ;;  %v1217_v52 = vcombine.low %v1139_v44, %v1146_v45  ;;  %v2217_v53 = vcombine.high %v1139_v44, %v1146_v45 }
 0x21c   : > { %v1089_v54 = vrot.slane %v1081_v49, %v3320_v32  ;;  %v1096_v55 = vrot.slane %v1082_v50, %v3320_v32  ;;  %v1167_v56 = vcombine.low %v1073_v48, %v1080_v40  ;;  %v2215_v57 = vcombine.high %v1073_v48, %v1080_v40 }
 0x21d   : > { %v1224_v58 = vrot.slane %v1217_v52, %v3312_v23  ;;  %v1232_v59 = vrot.slane %v2217_v53, %v3312_v23  ;;  %v1233_v60 = vcombine.low %v1155_v51, %v1162_v47  ;;  %v2218_v61 = vcombine.high %v1155_v51, %v1162_v47 }
 0x21e   : > { %v1174_v62 = vrot.slane %v1167_v56, %v3312_v23  ;;  %v1182_v35 = vrot.slane %v2215_v57, %v3312_v23  ;;  %v1183_v63 = vcombine.low %v1089_v54, %v1096_v55  ;;  %v2216_v0 = vcombine.high %v1089_v54, %v1096_v55 }
 0x21f   : > { %v1240_v1 = vrot.slane %v1233_v60, %v3312_v23  ;;  %v1248_v2 = vrot.slane %v2218_v61, %v3312_v23  ;;  %v1249_v3 = vcombine.low %v1224_v58, %v1232_v59 }
 0x220   : > { %v1190_v4 = vrot.slane %v1183_v63, %v3312_v23  ;;  %v1198_v5 = vrot.slane %v2216_v0, %v3312_v23  ;;  %v1199_v6 = vcombine.low %v1174_v62, %v1182_v35 }
 0x221   : > { %v1257_v43 = vcombine.low %v1240_v1, %v1248_v2  ;;  %v1256_v8 = vrot.slane %v1249_v3, %v3320_v32 }
 0x222   : > { %v1207_v7 = vcombine.low %v1190_v4, %v1198_v5  ;;  %v1206_v10 = vrot.slane %v1199_v6, %v3320_v32 }
 0x223   : > { %v1264_v9 = vrot.slane %v1257_v43, %v3320_v32 }
 0x224   : > { %v1214_v11 = vrot.slane %v1207_v7, %v3320_v32 }
 0x225   : > { %v1265_v12 = vcombine.low %v1256_v8, %v1264_v9  ;;  %v1266_v13 = vcombine.high %v1256_v8, %v1264_v9 }
 0x226   : > { %v1215_v16 = vcombine.low %v1206_v10, %v1214_v11  ;;  %v1216_v17 = vcombine.high %v1206_v10, %v1214_v11 }
 0x227   : > { %1268 = vst.msk [vmem:[#allocation4 + $0x8] sm:$0xff] %vm596_vm0, %v1265_v12  ;;  %1270 = vst.msk [vmem:[#allocation4 + $0x18] sm:$0xff] %vm596_vm0, %v1266_v13 }
 0x228   : > { %1267 = vst.msk [vmem:[#allocation4] sm:$0xff] %vm596_vm0, %v1215_v16  ;;  %1269 = vst.msk [vmem:[#allocation4 + $0x10] sm:$0xff] %vm596_vm0, %v1216_v17 }
 0x229 PF: > { %v1275_v23 = vld [vmem:[#allocation3] sm:$0xff]  ;;  %v1276_v18 = vld [vmem:[#allocation3 + $0x8] sm:$0xff]  ;;  %vm1283_vm1 = vcmask 523264   ;;  %v3028_v19 = vmov 0.0|0.0   ;;  %vm3029_vm3 = vmmov 0   ;;  %v3030_v20 = vmov 0.0  }
 0x22a   : > { %2626 = vmatprep.subr.bf16.mxu1 %v3028_v19  ;;  %v2627_v32 = vpack.c.bf16 %v1276_v18, %v1275_v23  ;;  %vm2628_vm2 = vmpackc.low %vm1283_vm1, %vm1283_vm1  ;;  %2457 = vmatprep.mubr.msk.f32.mxu1 %vm3029_vm3, %v3030_v20  ;;  %s2219_s30 = sshll.u32 %s2999_s21, 3  ;;  %v1277_v21 = vld [vmem:[#allocation3 + $0x10] sm:$0xff]  ;;  %v1278_v22 = vld [vmem:[#allocation3 + $0x18] sm:$0xff]  ;;  %vm1442_vm4 = vcmask 130048   ;;  %s3033_s27 = smov 64  }
 0x22b   : > { %s1272_s26 = scalar_lea.vmem [#allocation2], %s2219_s30  ;;  %v2631_v26 = vpack.c.bf16 %v1278_v22, %v1277_v21  ;;  %v1979_v21 = vld [vmem:[#allocation10 + $0x8] sm:$0xff]  ;;  %v1980_v22 = vld [vmem:[#allocation10 + $0x10] sm:$0xff]  ;;  %s2248_s12 = sshll.u32 %s3003_s22, 1 }
 0x22c   : > { %2629 = vmatpush3.bf16.xpose.msk.msra.mxu1 %vm2628_vm2, %v2627_v32  ;;  %v1273_v24 = vld [vmem:[%s1272_s26] sm:$0xff]  ;;  %v1274_v27 = vld [vmem:[%s1272_s26 + $0x10] sm:$0xff]  ;;  %s2084_s9 = sadd.s32 %s2999_s21, %s2248_s12  ;;  %s2088_s1 = sshll.u32 %s258_s4, 4  ;;  %s3496_s1 = int_to_ptr.vmem [resolvable:$true] %s2088_s1 }
 0x22d   : > { %2630 = vmatprep.subr.bf16.mxu1 %v3028_v19  ;;  %v1978_v32 = vld [vmem:[#allocation10] sm:$0xff]  ;;  %s2249_s18 = sshll.u32 %s2084_s9, 7  ;;  %s3600_s8 = sld [smem:[#allocation21_spill]] }
 0x22e   : > { %v1280_v14 = vld [vmem:[#allocation4 + $0x8] sm:$0xff]  ;;  %v1282_v49 = vld [vmem:[#allocation4 + $0x18] sm:$0xff]  ;;  %s2073_s21 = scalar_lea.sflag [#allocation7], %s256_s23  ;;  %s2889_s22 = scalar_lea.vmem %s3496_s1, 128 }
 0x22f   : > { %v1279_v36 = vld [vmem:[#allocation4] sm:$0xff]  ;;  %v1281_v40 = vld [vmem:[#allocation4 + $0x10] sm:$0xff]  ;;  %p2890_p1 = scmp.ne.s32.totalorder %s3496_s1, %s2889_s22  ;;  %p3601_p3 = scmp.ne.s32.totalorder %s3584_s5, 0 }
 0x230   : > { %s3034_s28 = smov [#allocation11]  }
 0x231   : > { %p2891_p13 = pnand %p2890_p1, %p3601_p3  ;;  %s2893_s30 = sshll.u32 %s3034_s28, 4  ;;  %s2894_s30 = int_to_ptr.vmem [resolvable:$false] %s2893_s30 }
 0x232   : > { %s2895_s26 = scalar_lea.vmem %s2894_s30, 256  ;;  %p2896_p9 = scmp.lt.s32.totalorder %s3496_s1, %s2894_s30 }
 0x233   : > { %2458 = vmatmul.mubr.msk.f32.vlgmr.msra.gmra.mrb[0].mxu1 %vm1283_vm1, %v1273_v24  ;;  %v2635_v24 = vpack.c.bf16 %v1979_v21, %v1978_v32  ;;  %s3494_s11 = scalar_lea.hbm %s3600_s8, %s2249_s18  ;;  %p2892_p7 = pneg %p2891_p13 }
 0x234   : > { %2633 = vmatpush3.bf16.xpose.msk.msra.mxu1 %vm2628_vm2, %v2631_v26  ;;  %2464 = vmatprep.mubr.msk.f32.mxu1 %vm3029_vm3, %v3030_v20  ;;  %v1981_v26 = vld [vmem:[#allocation10 + $0x18] sm:$0xff]  ;;  %p2897_p11 = scmp.lt.s32.totalorder %s2895_s26, %s2889_s22 }
 0x236   : > { %p2898_p5 = por %p2897_p11, %p2896_p9 }
 0x238   : > { %p2899_p8 = pnand %p2898_p5, %p2892_p7 }
 0x23b   : > { %2465 = vmatmul.mubr.msk.f32.vlgmr.msra.gmra.mrb[2].mxu1 %vm1283_vm1, %v1274_v27 }
 0x306   : > { %v1359_v28 = vpop.f32.mrb[0].mxu1 }
 0x307   : > { %v2459_v29 = vpop.f32.mrb[1].mxu1  ;;  %v1443_v30 = vsel %vm1442_vm4, %v1359_v28, -inf }
 0x308   : > { %1444 = vmax.xlane.f32.xlu0 %v1443_v30  ;;  %v1982_v30 = vld [vmem:[#allocation10 + $0x20] sm:$0xff] }
 0x30e   : > { %v1438_v31 = vpop.f32.mrb[2].mxu1 }
 0x30f   : > { %v2466_v33 = vpop.f32.mrb[3].mxu1  ;;  %v1446_v34 = vsel %vm1442_vm4, %v1438_v31, -inf }
 0x310   : > { %1447 = vmax.xlane.f32.xlu0 %v1446_v34  ;;  %v1984_v34 = vld [vmem:[#allocation10 + $0x30] sm:$0xff] }
 0x33d   : > { %1465 = vxpose.xlu0.b32.start [1/2] (short) (narrow) %v1279_v36, 64  ;;  %v1985_v36 = vld [vmem:[#allocation10 + $0x38] sm:$0xff] }
 0x341   : > { %1466 = vxpose.xlu0.b32.end [2/2] (short) (narrow) %v1280_v14, 64  ;;  %v2644_v14 = vpack.c.bf16 %v1985_v36, %v1984_v34 }
 0x395   : > { %v1445_v37 = vpop.xlane.xlu0 %1444 }
 0x396   : > { %v1449_v38 = vsub.f32 %v1359_v28, %v1445_v37  ;;  %v2638_v28 = vpack.c.bf16 %v1981_v26, %v1980_v22  ;;  %v1986_v37 = vld [vmem:[#allocation10 + $0x40] sm:$0xff] }
 0x397   : > { %v2246_v26 = vld [vmem:[%s3563_s3] ss:$0 sm:$0xff] }
 0x398   : > { %v1451_v39 = vmul.f32 1.442695, %v1449_v38  ;;  %v1987_v38 = vld [vmem:[#allocation10 + $0x48] sm:$0xff] }
 0x39a   : > { %2795 = vpow2.f32 %v1451_v39  ;;  %v2647_v39 = vpack.c.bf16 %v1987_v38, %v1986_v37 }
 0x39d   : > { %v1448_v41 = vpop.xlane.xlu0 %1447 }
 0x39e   : > { %v1450_v42 = vsub.f32 %v1438_v31, %v1448_v41  ;;  %v1983_v31 = vld [vmem:[#allocation10 + $0x28] sm:$0xff]  ;;  %v1988_v41 = vld [vmem:[#allocation10 + $0x50] sm:$0xff] }
 0x39f   : > { %v2641_v33 = vpack.c.bf16 %v1983_v31, %v1982_v30 }
 0x3a0   : > { %v1453_v15 = vmul.f32 1.442695, %v1450_v42  ;;  %v1989_v42 = vld [vmem:[#allocation10 + $0x58] sm:$0xff] }
 0x3a2   : > { %2797 = vpow2.f32 %v1453_v15  ;;  %v2650_v15 = vpack.c.bf16 %v1989_v42, %v1988_v41 }
 0x3a4   : > { %v2796_v44 = vpop.eup %2795 }
 0x3a5   : > { %v1455_v45 = vsel %vm1442_vm4, %v2796_v44, 0.0 }
 0x3a6   : > { %1456 = vadd.xlane.f32.xlu1 %v1455_v45  ;;  %v1991_v45 = vld [vmem:[#allocation10 + $0x68] sm:$0xff] }
 0x3ac   : > { %v2798_v46 = vpop.eup %2797 }
 0x3ad   : > { %v1458_v25 = vsel %vm1442_vm4, %v2798_v46, 0.0 }
 0x3ae   : > { %1459 = vadd.xlane.f32.xlu1 %v1458_v25  ;;  %v1992_v25 = vld [vmem:[#allocation10 + $0x70] sm:$0xff] }
 0x3bd   : > { %v1481_v48 = vpop.trf.xlu0 }
 0x3be   : > { %2469 = vmatprep.mubr.msk.f32.mxu0 %vm1442_vm4, %v1481_v48  ;;  %v1993_v48 = vld [vmem:[#allocation10 + $0x78] sm:$0xff] }
 0x3c1   : > { %v1482_v50 = vpop.trf.xlu0 }
 0x3c5   : > { %v1483_v51 = vpop.trf.xlu0 }
 0x3c9   : > { %v1484_v52 = vpop.trf.xlu0 }
 0x3cd   : > { %v1485_v54 = vpop.trf.xlu0 }
 0x3d1   : > { %v1486_v57 = vpop.trf.xlu0 }
 0x3d5   : > { %v1487_v60 = vpop.trf.xlu0 }
 0x3d9   : > { %v1488_v61 = vpop.trf.xlu0 }
 0x3e1   : > { %1629 = vxpose.xlu1.b32.start [1/2] (short) (narrow) %v1281_v40, 64  ;;  %v2656_v40 = vpack.c.bf16 %v1993_v48, %v1992_v25 }
 0x3e5   : > { %1630 = vxpose.xlu1.b32.end [2/2] (short) (narrow) %v1282_v49, 64  ;;  %v3031_v49 = vmov 1983009808  }
 0x433   : > { %v1457_v47 = vpop.xlane.xlu1 %1456 }
 0x434   : > { %2799 = vrcp.f32 %v1457_v47 }
 0x43b   : > { %v1460_v53 = vpop.xlane.xlu1 %1459 }
 0x43c   : > { %2801 = vrcp.f32 %v1460_v53  ;;  %v3032_v53 = vmov 1934713408  }
 0x43e   : > { %v2800_v55 = vpop.eup %2799 }
 0x43f   : > { %v1463_v56 = vmul.f32 %v2800_v55, %v2796_v44  ;;  %v1990_v44 = vld [vmem:[#allocation10 + $0x60] sm:$0xff] }
 0x441   : > { %2467 = vmatprep.subr.msk.mxu0 %vm1442_vm4, %v1463_v56 }
 0x442   : > { %2468 = vmatpush3.xpose.msk.msra.mxu0 %vm1442_vm4, %v1463_v56 }
 0x443   : > { %2634 = vmatprep.subr.bf16.mxu0 %v3028_v19 }
 0x445   : > { %2470 = vmatmul.mubr.msk.f32.vlgmr.msra.gmra.mrb[0].mxu0 %vm1442_vm4, %v1482_v50  ;;  %v1859_v50 = vunpack.c.l.s4 %v3031_v49 }
 0x446   : > { %v2802_v58 = vpop.eup %2801  ;;  %2472 = vmatprep.mubr.msk.f32.mxu0 %vm1442_vm4, %v1483_v51  ;;  %2636 = vmatpush3.bf16.msra.mxu0 %v2635_v24  ;;  %v1861_v51 = vlaneseq }
 0x447   : > { %v1464_v59 = vmul.f32 %v2802_v58, %v2798_v46  ;;  %2637 = vmatprep.subr.bf16.mxu0 %v3028_v19  ;;  %v2653_v46 = vpack.c.bf16 %v1991_v45, %v1990_v44  ;;  %v1860_v47 = vunpack.c.0.s8 %v1859_v50 }
 0x449   : > { %2481 = vmatprep.subr.msk.mxu1 %vm1442_vm4, %v1464_v59  ;;  %2473 = vmatmul.mubr.msk.f32.gmra.mrb[2].mxu0 %vm1442_vm4, %v1484_v52  ;;  %v1862_v52 = vshrl.u32 %v1861_v51, 7 }
 0x44a   : > { %2482 = vmatpush3.xpose.msk.msra.mxu1 %vm1442_vm4, %v1464_v59  ;;  %2475 = vmatprep.mubr.msk.f32.mxu0 %vm1442_vm4, %v1485_v54  ;;  %v1890_v54 = vunpack.c.l.s4 %v3032_v53 }
 0x44b   : > { %2639 = vmatpush3.bf16.msra.mxu0 %v2638_v28  ;;  %v1863_v56 = vsub.s32 %v1860_v47, %v1862_v52 }
 0x44c   : > { %2640 = vmatprep.subr.bf16.mxu0 %v3028_v19  ;;  %v1891_v58 = vunpack.c.0.s8 %v1890_v54 }
 0x44d   : > { %2476 = vmatmul.mubr.msk.f32.gmra.mrb[4].mxu0 %vm1442_vm4, %v1486_v57 }
 0x44e   : > { %2478 = vmatprep.mubr.msk.f32.mxu0 %vm1442_vm4, %v1487_v60 }
 0x44f   : > { %2642 = vmatpush3.bf16.msra.mxu0 %v2641_v33 }
 0x450   : > { %2643 = vmatprep.subr.bf16.mxu0 %v3028_v19 }
 0x451   : > { %2479 = vmatmul.mubr.msk.f32.gmra.mrb[6].mxu0 %vm1442_vm4, %v1488_v61 }
 0x452   : > { %2527 = vmatprep.mubr.msk.f32.mxu0 %vm3029_vm3, %v3030_v20 }
 0x453   : > { %2645 = vmatpush3.bf16.msra.mxu0 %v2644_v14 }
 0x454   : > { %2646 = vmatprep.subr.bf16.mxu0 %v3028_v19 }
 0x457   : > { %2648 = vmatpush3.bf16.msra.mxu0 %v2647_v39 }
 0x458   : > { %2649 = vmatprep.subr.bf16.mxu0 %v3028_v19 }
 0x45b   : > { %2651 = vmatpush3.bf16.msra.mxu0 %v2650_v15 }
 0x45c   : > { %2652 = vmatprep.subr.bf16.mxu0 %v3028_v19 }
 0x45f   : > { %2654 = vmatpush3.bf16.msra.mxu0 %v2653_v46 }
 0x460   : > { %2655 = vmatprep.subr.bf16.mxu0 %v3028_v19 }
 0x461   : > { %v1645_v62 = vpop.trf.xlu1 }
 0x462   : > { %2483 = vmatprep.mubr.msk.f32.mxu1 %vm1442_vm4, %v1645_v62  ;;  %v1894_v62 = vsub.s32 %v1891_v58, %v1862_v52 }
 0x463   : > { %2657 = vmatpush3.bf16.msra.mxu0 %v2656_v40 }
 0x465   : > { %v1646_v35 = vpop.trf.xlu1 }
 0x466   : > { %2484 = vmatmul.mubr.msk.f32.vlgmr.msra.gmra.mrb[4].mxu1 %vm1442_vm4, %v1646_v35 }
 0x469   : > { %v1647_v63 = vpop.trf.xlu1 }
 0x46a   : > { %2486 = vmatprep.mubr.msk.f32.mxu1 %vm1442_vm4, %v1647_v63 }
 0x46d   : > { %v1648_v0 = vpop.trf.xlu1 }
 0x46e   : > { %2487 = vmatmul.mubr.msk.f32.gmra.mrb[6].mxu1 %vm1442_vm4, %v1648_v0 }
 0x471   : > { %v1649_v1 = vpop.trf.xlu1 }
 0x472   : > { %2489 = vmatprep.mubr.msk.f32.mxu1 %vm1442_vm4, %v1649_v1 }
 0x475   : > { %v1650_v2 = vpop.trf.xlu1 }
 0x476   : > { %2490 = vmatmul.mubr.msk.f32.gmra.mrb[8].mxu1 %vm1442_vm4, %v1650_v2 }
 0x479   : > { %v1651_v3 = vpop.trf.xlu1 }
 0x47a   : > { %2492 = vmatprep.mubr.msk.f32.mxu1 %vm1442_vm4, %v1651_v3 }
 0x47d   : > { %v1652_v4 = vpop.trf.xlu1 }
 0x47e   : > { %2493 = vmatmul.mubr.msk.f32.gmra.mrb[10].mxu1 %vm1442_vm4, %v1652_v4 }
 0x518   : > { %v2471_v5 = vpop.f32.mrb[0].mxu0 }
 0x519   : > { %v1590_v6 = vpop.f32.mrb[1].mxu0 }
 0x51a   : > { %1793 = vxpose.xlu0.b32.start [1/8] (short) (narrow) %v1590_v6, 8 }
 0x51c   : > { %v2474_v43 = vpop.f32.mrb[2].mxu0 }
 0x51d   : > { %v1600_v7 = vpop.f32.mrb[3].mxu0 }
 0x51e   : > { %1794 = vxpose.xlu0.b32.cont [2/8] (short) (narrow) %v2471_v5, 8 }
 0x520   : > { %v2477_v8 = vpop.f32.mrb[4].mxu0 }
 0x521   : > { %v1610_v9 = vpop.f32.mrb[5].mxu0 }
 0x522   : > { %1795 = vxpose.xlu0.b32.cont [3/8] (short) (narrow) %v1600_v7, 8 }
 0x524   : > { %v2480_v10 = vpop.f32.mrb[6].mxu0 }
 0x525   : > { %v1620_v11 = vpop.f32.mrb[7].mxu0 }
 0x526   : > { %1796 = vxpose.xlu0.b32.cont [4/8] (short) (narrow) %v2474_v43, 8 }
 0x52a   : > { %1797 = vxpose.xlu0.b32.cont [5/8] (short) (narrow) %v1610_v9, 8 }
 0x52e   : > { %1798 = vxpose.xlu0.b32.cont [6/8] (short) (narrow) %v2477_v8, 8 }
 0x532   : > { %1799 = vxpose.xlu0.b32.cont [7/8] (short) (narrow) %v1620_v11, 8 }
 0x536   : > { %1800 = vxpose.xlu0.b32.end [8/8] (short) (narrow) %v2480_v10, 8 }
 0x539   : > { %v2485_v12 = vpop.f32.mrb[4].mxu1 }
 0x53a   : > { %v1754_v13 = vpop.f32.mrb[5].mxu1 }
 0x53b   : > { %1825 = vxpose.xlu1.b32.start [1/8] (short) (narrow) %v1754_v13, 8 }
 0x53f   : > { %1826 = vxpose.xlu1.b32.cont [2/8] (short) (narrow) %v2485_v12, 8 }
 0x541   : > { %v2488_v16 = vpop.f32.mrb[6].mxu1 }
 0x542   : > { %v1764_v17 = vpop.f32.mrb[7].mxu1 }
 0x543   : > { %1827 = vxpose.xlu1.b32.cont [3/8] (short) (narrow) %v1764_v17, 8 }
 0x547   : > { %1828 = vxpose.xlu1.b32.cont [4/8] (short) (narrow) %v2488_v16, 8 }
 0x549   : > { %v2491_v23 = vpop.f32.mrb[8].mxu1 }
 0x54a   : > { %v1774_v18 = vpop.f32.mrb[9].mxu1 }
 0x54b   : > { %1829 = vxpose.xlu1.b32.cont [5/8] (short) (narrow) %v1774_v18, 8 }
 0x54f   : > { %1830 = vxpose.xlu1.b32.cont [6/8] (short) (narrow) %v2491_v23, 8 }
 0x551   : > { %v2494_v27 = vpop.f32.mrb[10].mxu1 }
 0x552   : > { %v1784_v29 = vpop.f32.mrb[11].mxu1 }
 0x553   : > { %1831 = vxpose.xlu1.b32.cont [7/8] (short) (narrow) %v1784_v29, 8 }
 0x557   : > { %1832 = vxpose.xlu1.b32.end [8/8] (short) (narrow) %v2494_v27, 8 }
 0x59a   : > { %v1809_v55 = vpop.trf.xlu0 }
 0x59b   : > { %v1857_v57 = vcombine.high %v1809_v55, %v3030_v20  ;;  %v1864_v59 = vrot.slane %v1809_v55, %v1863_v56 }
 0x59d   : > { %v1871_v61 = vrot.slane %v1857_v57, %v1863_v56 }
 0x5bb   : > { %v1841_v60 = vpop.trf.xlu1 }
 0x5bc   : > { %v1872_v35 = vcombine.high %v1841_v60, %v3030_v20  ;;  %v1879_v19 = vrot.slane %v1841_v60, %v1863_v56 }
 0x5be   : > { %v1886_v63 = vrot.slane %v1872_v35, %v1863_v56  ;;  %v1887_v0 = vcombine.low %v1864_v59, %v1879_v19  ;;  %v1888_v1 = vcombine.high %v1864_v59, %v1879_v19 }
 0x5c0   : > { %v1895_v2 = vrot.slane %v1887_v0, %v1894_v62  ;;  %v1902_v3 = vrot.slane %v1888_v1, %v1894_v62  ;;  %v1903_v4 = vcombine.low %v1871_v61, %v1886_v63  ;;  %v1904_v5 = vcombine.high %v1871_v61, %v1886_v63 }
 0x5c2   : > { %v1911_v6 = vrot.slane %v1903_v4, %v1894_v62  ;;  %v1918_v43 = vrot.slane %v1904_v5, %v1894_v62  ;;  %v1923_v7 = vcombine.low %v1895_v2, %v1902_v3  ;;  %v2244_v8 = vcombine.high %v1895_v2, %v1902_v3 }
 0x5c4   : > { %v1930_v9 = vrot.slane %v1923_v7, %v1863_v56  ;;  %v1938_v10 = vrot.slane %v2244_v8, %v1863_v56  ;;  %v1939_v11 = vcombine.low %v1911_v6, %v1918_v43  ;;  %v2245_v12 = vcombine.high %v1911_v6, %v1918_v43 }
 0x5c6   : > { %v1946_v13 = vrot.slane %v1939_v11, %v1863_v56  ;;  %v1954_v20 = vrot.slane %v2245_v12, %v1863_v56  ;;  %v1955_v16 = vcombine.low %v1930_v9, %v1938_v10 }
 0x5c8   : > { %v1963_v17 = vcombine.low %v1946_v13, %v1954_v20  ;;  %v1962_v23 = vrot.slane %v1955_v16, %v1894_v62 }
 0x5ca   : > { %v1970_v18 = vrot.slane %v1963_v17, %v1894_v62 }
 0x5cc   : > { %v1972_v32 = vcombine.high %v1962_v23, %v1970_v18  ;;  %v1971_v21 = vcombine.low %v1962_v23, %v1970_v18 }
 0x5ce   : > { %1974 = vrot.lane.b32.xlu0 %v1972_v32, %s3033_s27 }
 0x640   : > { %v1975_v22 = vpop.permute.xlu0 %1974 }
 0x641   : > { %v1977_v24 = vsel %vm1283_vm1, %v1971_v21, %v1975_v22 }
 0x642   : > { %2528 = vmatmul.mubr.f32.vlgmr.msra.gmra.mrb[8].mxu0 %v1977_v24 }
 0x715   : > { %v2067_v27 = vpop.f32.mrb[8].mxu0 }
 0x716   : > { %v2068_v28 = vadd.f32 %v2246_v26, %v2067_v27  ;;  %v2529_v29 = vpop.f32.mrb[9].mxu0 }
 0x718   : > { %2071 = vst [vmem:[%s258_s4] sm:$0xff] %v2068_v28 }
 0x719   : > { %2902 = shalt.err (!%p2899_p8)
}
 0x71a   : > { %s2903_s23 = scalar_lea.hbm %s3494_s11, 128  ;;  %s2907_s27 = scalar_lea.hbm %s3600_s8, 512 }
 0x71b   : > { %p2904_p12 = scmp.ne.s32.totalorder %s3494_s11, %s2903_s23  ;;  %p2908_p10 = scmp.lt.u32.totalorder %s3494_s11, %s3600_s8 }
 0x71c   : > { %p2909_p0 = scmp.lt.u32.totalorder %s2907_s27, %s2903_s23  ;;  %p2911_p1 = scmp.lt.u32.totalorder %s2903_s23, %s3494_s11 }
 0x71d   : > { %p2905_p2 = pnand %p2904_p12, %p3601_p3 }
 0x71e   : > { %p2910_p4 = por %p2909_p0, %p2908_p10 }
 0x71f   : > { %p2906_p6 = pneg %p2905_p2 }
 0x720   : > { %p2912_p13 = por %p2911_p1, %p2910_p4 }
 0x722   : > { %p2913_p7 = pnand %p2912_p13, %p2906_p6 }
 0x724   : > { %2916 = shalt.err (!%p2913_p7)
}
 0x725   : > { %2668 = dma.vmem_to_hbm [thread:$0]  (%p3601_p3), %s3496_s1, 128, %s3494_s11, %s2073_s21  }
 0x726 PF: > { %s3602_s6 = sld [smem:[#allocation15_spill]]  ;;  %s3603_s13 = sld [smem:[#allocation17_spill]] }
 0x727   : > { %p2690_p9 = scmp.ge.s32.totalorder %s3015_s25, 2 }
 0x72c   : > { %s2100_s18 = sand.u32 1, %s3602_s6   ;;  %p3604_p11 = scmp.ne.s32.totalorder %s3603_s13, 0 }
 0x72d   : > { %s2101_s14 = scalar_lea.sflag [#allocation7], %s2100_s18 }
 0x72e   : > { %p2682_p5 = pnand %p2690_p9, %p3604_p11 }
 0x730   : > { %2970 = dma.done.wait (!%p2682_p5), %s2101_s14, 128  }
 0x731   : > { %2972 = vsyncadd (!%p2682_p5), %s2101_s14, 4294967168  ;;  %s21_s25 = sadd.s32 1, %s3015_s25   ;;  %s3605_s5 = smov %s3233_s15 }
 0x732   : > { %p18_p8 = scmp.ge.s32.totalorder %s21_s25, 6   ;;  %s3606_s21 = sld [smem:[#allocation16_spill]] }
 0x733   : > { %s3607_s23 = sld [smem:[#allocation18_spill]]  ;;  %s3608_s15 = smov %s2979_s16 }
 0x734   : > { %s3609_s16 = smov %s2983_s17  ;;  %s3610_s17 = smov %s3238_s2 }
 0x735   : > { %s3611_s18 = smov %s2991_s19  ;;  %s3612_s19 = smov %s2995_s20 }
 0x736   : > { %s3613_s20 = smov %s3605_s5  ;;  %s3614_s22 = smov %s3011_s24 }
 0x737   : > { %s3615_s24 = smov %s3621_s29  ;;  %20 = sbr.rel (!%p18_p8) target bundleno = 14 (0xe), region = 94 }
 0x73e   :  { %2106 = vsyncpa [#allocation6], 1 }
 0x73f   :  { %2108 = vsyncpa [#allocation6 + $0x1], 1 }
 0x740   :  { %2109 = vsyncpa [#allocation9], 1 }
 0x741   :  { %2110 = vsyncpa [#allocation7], 1 }
 0x742   :  { %2112 = vsyncpa [#allocation7 + $0x1], 1 }

</bundles_post_ra>
